<compile_context>
chip_gen: v7x
topology: tpu7x:2x2x1
jax: 0.10.0
libtpu: 0.0.40
codegen_flags: <defaults>
</compile_context>

<pallas_src>
import jax
import jax.numpy as jnp
from jax.experimental import pallas as pl
from jax.experimental.pallas import tpu as pltpu


def cross_layer_kernel(x0_ref, xi_ref, ut_ref, vt_ref, b_ref, o_ref):
    xi = xi_ref[...]                                        # (tb, D)
    x0 = x0_ref[...]                                        # (tb, D)

    # xv = xi @ V  — contract the D axes of xi (tb, D) and Vt (R, D).
    # No in-kernel transpose: weights stay in their lane-dense (R, D) layout.
    xv = jax.lax.dot_general(
        xi, vt_ref[...],
        dimension_numbers=(((1,), (1,)), ((), ())),
        preferred_element_type=jnp.float32)                 # (tb, R) f32 acc

    # uv = xv @ U.T + bias — Ut is already (R, D); MXU consumes it natively.
    uv = jnp.dot(xv.astype(ut_ref.dtype), ut_ref[...],
                 preferred_element_type=jnp.float32)        # (tb, D) f32 acc
    uv = uv + b_ref[...].astype(jnp.float32)

    # out = x0 * uv + xi — elementwise tail in f32, single cast at the store.
    # TODO(synk): for production D < 128, re-view x0/xi/out in the wrapper as
    # a lane-dense (B/k, k*D) slab to turn the masked vst.msk stores into full
    # unmasked vst (keep the (B, D) view only for the xi@V contraction).
    out = x0.astype(jnp.float32) * uv + xi.astype(jnp.float32)
    o_ref[...] = out.astype(o_ref.dtype)


def _round_down(x, m):
    return (x // m) * m


def _round_up(x, m):
    return ((x + m - 1) // m) * m


def cross_layer(x0, xi, U, V, bias, *, tile_b=None,
                vmem_budget_bytes=32 * 1024 * 1024):
    B, D = x0.shape
    Din, R = U.shape
    assert Din == D and V.shape == (D, R) and bias.shape == (D,)

    act_bytes = jnp.dtype(x0.dtype).itemsize
    w_bytes = jnp.dtype(U.dtype).itemsize
    resident_bytes = 2 * R * D * w_bytes + D * 4            # Ut, Vt, bias

    if tile_b is None:
        # Streamed per batch row: x0 + xi in, out back; each double-buffered
        # by the BlockSpec software pipeline.
        per_row = 3 * 2 * D * act_bytes
        budget = max(vmem_budget_bytes - resident_bytes, 8 * per_row)
        tile_b = max(8, _round_down(budget // per_row, 8))
        tile_b = min(tile_b, 2048)              # step overhead fully amortized
        tile_b = min(tile_b, _round_up(B, 8))   # never larger than padded batch
        if B >= 16:
            # Keep >= 2 grid steps so the "parallel" batch axis can shard
            # across v7x's two TensorCores and the pipeline has work to overlap.
            tile_b = min(tile_b, max(8, _round_up(pl.cdiv(B, 2), 8)))
    assert tile_b % 8 == 0, "tile_b must be a multiple of 8 (f32 sublane tiling)"

    # Pad ragged batches; zero rows are harmless and sliced off at the end.
    Bp = _round_up(B, tile_b)
    if Bp != B:
        pad = ((0, Bp - B), (0, 0))
        x0p, xip = jnp.pad(x0, pad), jnp.pad(xi, pad)
    else:
        x0p, xip = x0, xi

    # Transpose once in XLA (not per grid step inside the kernel).
    Ut = U.T                       # (R, D) — D on the lane axis
    Vt = V.T                       # (R, D)
    bias2d = bias.reshape(1, D)

    grid = (Bp // tile_b,)
    out = pl.pallas_call(
        cross_layer_kernel,
        out_shape=jax.ShapeDtypeStruct((Bp, D), x0.dtype),
        grid_spec=pltpu.PrefetchScalarGridSpec(
            num_scalar_prefetch=0,
            grid=grid,
            in_specs=[
                pl.BlockSpec((tile_b, D), lambda i: (i, 0)),   # x0   (streamed)
                pl.BlockSpec((tile_b, D), lambda i: (i, 0)),   # xi   (streamed)
                pl.BlockSpec((R, D), lambda i: (0, 0)),        # Ut   (resident)
                pl.BlockSpec((R, D), lambda i: (0, 0)),        # Vt   (resident)
                pl.BlockSpec((1, D), lambda i: (0, 0)),        # bias (resident)
            ],
            out_specs=pl.BlockSpec((tile_b, D), lambda i: (i, 0)),
        ),
        compiler_params=pltpu.CompilerParams(
            dimension_semantics=("parallel",),
            # Above the 16/32 MiB scoped defaults, below v7x's 64 MiB physical.
            vmem_limit_bytes=48 * 1024 * 1024,
        ),
    )(x0p, xip, Ut, Vt, bias2d)

    return out[:B] if Bp != B else out


if __name__ == "__main__":
    key = jax.random.PRNGKey(0)
    k0, k1, ku, kv = jax.random.split(key, 4)

    B = 24         # batch (exercises padding + a multi-step grid)
    D = 32         # input_dim
    R = 10         # rank

    x0 = jax.random.normal(k0, (B, D), dtype=jnp.float32)
    xi = jax.random.normal(k1, (B, D), dtype=jnp.float32)

    # Parameter init matching nn.Module.__init__: U, V ~ randn * 0.01, bias = 0.
    U = jax.random.normal(ku, (D, R), dtype=jnp.float32) * 0.01
    V = jax.random.normal(kv, (D, R), dtype=jnp.float32) * 0.01
    bias = jnp.zeros((D,), dtype=jnp.float32)

    out = cross_layer(x0, xi, U, V, bias)
    out = jax.block_until_ready(out)

    # Pure-JAX reference check.
    ref = x0 * (xi @ V @ U.T + bias) + xi
    assert out.shape == ref.shape
    assert jnp.allclose(out, ref, atol=1e-5, rtol=1e-5), "mismatch vs reference"

    print("KERNEL_OK")
</pallas_src>

<mosaic_0001>
module attributes {stable_mosaic.version = 11 : i64} {
  func.func @cross_layer_kernel(%arg0: i32, %arg1: memref<16x32xf32, #tpu.memory_space<vmem>>, %arg2: memref<16x32xf32, #tpu.memory_space<vmem>>, %arg3: memref<10x32xf32, #tpu.memory_space<vmem>>, %arg4: memref<10x32xf32, #tpu.memory_space<vmem>>, %arg5: memref<1x32xf32, #tpu.memory_space<vmem>>, %arg6: memref<16x32xf32, #tpu.memory_space<vmem>>) attributes {dimension_semantics = [#tpu.dimension_semantics<parallel>], iteration_bounds = array<i64: 2>, scalar_prefetch = 0 : i64, scratch_operands = 0 : i64, tpu.core_type = #tpu.core_type<tc>, window_params = [{transform_indices = @transform_0, window_bounds = array<i64: 16, 32>}, {transform_indices = @transform_1, window_bounds = array<i64: 16, 32>}, {pipeline_mode = #tpu.pipeline_mode<synchronous>, transform_indices = @transform_2, window_bounds = array<i64: 10, 32>}, {pipeline_mode = #tpu.pipeline_mode<synchronous>, transform_indices = @transform_3, window_bounds = array<i64: 10, 32>}, {pipeline_mode = #tpu.pipeline_mode<synchronous>, transform_indices = @transform_4, window_bounds = array<i64: 1, 32>}, {transform_indices = @transform_5, window_bounds = array<i64: 16, 32>}]} {
    %c0 = arith.constant 0 : index
    %c0_0 = arith.constant 0 : index
    %0 = vector.load %arg2[%c0, %c0_0] : memref<16x32xf32, #tpu.memory_space<vmem>>, vector<16x32xf32>
    %c0_1 = arith.constant 0 : index
    %c0_2 = arith.constant 0 : index
    %1 = vector.load %arg1[%c0_1, %c0_2] : memref<16x32xf32, #tpu.memory_space<vmem>>, vector<16x32xf32>
    %c0_3 = arith.constant 0 : index
    %c0_4 = arith.constant 0 : index
    %2 = vector.load %arg4[%c0_3, %c0_4] : memref<10x32xf32, #tpu.memory_space<vmem>>, vector<10x32xf32>
    %cst = arith.constant dense<0.000000e+00> : vector<16x10xf32>
    %3 = tpu.matmul %0, %2, %cst {dimension_numbers = #tpu.dot_dimension_numbers<[1], [1], [0], [0], [0, 0, 1, 0], [], []>} : vector<16x32xf32>, vector<10x32xf32>, vector<16x10xf32> -> vector<16x10xf32>
    %c0_5 = arith.constant 0 : index
    %c0_6 = arith.constant 0 : index
    %4 = vector.load %arg3[%c0_5, %c0_6] : memref<10x32xf32, #tpu.memory_space<vmem>>, vector<10x32xf32>
    %cst_7 = arith.constant dense<0.000000e+00> : vector<16x32xf32>
    %5 = tpu.matmul %3, %4, %cst_7 {dimension_numbers = #tpu.dot_dimension_numbers<[1], [0], [0], [1], [0, 0, 1, 1], [], []>} : vector<16x10xf32>, vector<10x32xf32>, vector<16x32xf32> -> vector<16x32xf32>
    %c0_8 = arith.constant 0 : index
    %c0_9 = arith.constant 0 : index
    %6 = vector.load %arg5[%c0_8, %c0_9] : memref<1x32xf32, #tpu.memory_space<vmem>>, vector<1x32xf32>
    %7 = vector.broadcast %6 : vector<1x32xf32> to vector<16x32xf32>
    %8 = arith.addf %5, %7 : vector<16x32xf32>
    %9 = arith.mulf %1, %8 : vector<16x32xf32>
    %10 = arith.addf %9, %0 : vector<16x32xf32>
    %c0_10 = arith.constant 0 : index
    %c0_11 = arith.constant 0 : index
    %11 = vector.load %arg6[%c0_10, %c0_11] : memref<16x32xf32, #tpu.memory_space<vmem>>, vector<16x32xf32>
    tpu.vector_store %arg6[%c0_10, %c0_11], %10 {strides = array<i32>} : memref<16x32xf32, #tpu.memory_space<vmem>>, vector<16x32xf32>,
    return
  }
  func.func @transform_0(%arg0: i32) -> (i32, i32) {
    %c0_i32 = arith.constant 0 : i32
    %c0_i32_0 = arith.constant 0 : i32
    return %arg0, %c0_i32 : i32, i32
  }
  func.func @transform_1(%arg0: i32) -> (i32, i32) {
    %c0_i32 = arith.constant 0 : i32
    %c0_i32_0 = arith.constant 0 : i32
    return %arg0, %c0_i32 : i32, i32
  }
  func.func @transform_2(%arg0: i32) -> (i32, i32) {
    %c0_i32 = arith.constant 0 : i32
    %c0_i32_0 = arith.constant 0 : i32
    %c0_i32_1 = arith.constant 0 : i32
    return %c0_i32, %c0_i32_0 : i32, i32
  }
  func.func @transform_3(%arg0: i32) -> (i32, i32) {
    %c0_i32 = arith.constant 0 : i32
    %c0_i32_0 = arith.constant 0 : i32
    %c0_i32_1 = arith.constant 0 : i32
    return %c0_i32, %c0_i32_0 : i32, i32
  }
  func.func @transform_4(%arg0: i32) -> (i32, i32) {
    %c0_i32 = arith.constant 0 : i32
    %c0_i32_0 = arith.constant 0 : i32
    %c0_i32_1 = arith.constant 0 : i32
    return %c0_i32, %c0_i32_0 : i32, i32
  }
  func.func @transform_5(%arg0: i32) -> (i32, i32) {
    %c0_i32 = arith.constant 0 : i32
    %c0_i32_0 = arith.constant 0 : i32
    return %arg0, %c0_i32 : i32, i32
  }
}

</mosaic_0001>

<bundles_post_ra>
// kernel: tpu_custom_call.1
= control target key start
LH: loop header
LB: loop body
LE: loop exit
PB: predicated region body
PF: predicated region fallthrough
CT: control target
= control target key end

     0   :  { %s1329_s0 = inlined_call_operand.hbm [shape: f32[32,32], index: 0, kind: input, shape index: {}]   ;;  %s1330_s1 = inlined_call_operand.hbm [shape: f32[32,32], index: 1, kind: input, shape index: {}]   ;;  %s1331_s2 = inlined_call_operand.hbm [shape: f32[10,32], index: 2, kind: input, shape index: {}]   ;;  %s1332_s3 = inlined_call_operand.hbm [shape: f32[10,32], index: 3, kind: input, shape index: {}]   ;;  %s1333_s4 = inlined_call_operand.vmem [shape: f32[1,32], index: 4, kind: input, shape index: {}]   ;;  %s1334_s5 = inlined_call_operand.hbm [shape: f32[32,32], index: 5, kind: output, shape index: {}]  }
   0x1   :  { %1342 = sst [smem:[#allocation16_spill]] %s1329_s0 }
   0x2   :  { %1343 = sst [smem:[#allocation17_spill]] %s1331_s2 }
   0x3   :  { %10 = vsyncpa [#allocation3], 0 }
   0x4   :  { %12 = vsyncpa [#allocation3 + $0x1], 0 }
   0x5   :  { %13 = vsyncpa [#allocation6], 0 }
   0x6   :  { %15 = vsyncpa [#allocation6 + $0x1], 0 }
   0x7   :  { %16 = vsyncpa [#allocation9], 0 }
   0x8   :  { %17 = vsyncpa [#allocation4], 0 }
   0x9   :  { %19 = vsyncpa [#allocation4 + $0x1], 0  ;;  %s1019_s18 = smov 0   ;;  %s1021_s19 = smov 0  }
   0xa   :  { %s1023_s20 = smov 0   ;;  %s1025_s21 = smov 0  }
   0xb LB: > { %s1040_s22 = sadd.s32 4294967295, %s977_s21   ;;  %s639_s23 = sadd.s32 4294967294, %s977_s21   ;;  %s977_s21 = sphi %s1025_s21, %s1366_s21   ;;  %s973_s20 = sphi %s1023_s20, %s1365_s20   ;;  %s969_s19 = sphi %s1021_s19, %s1364_s19   ;;  %s965_s18 = sphi %s1019_s18, %s1363_s18  }
   0xc   : > { %p45_p0 = scmp.ne.s32.totalorder %s969_s19, %s965_s18  ;;  %p1335_p1 = scmp.eq.s32.totalorder %s1040_s22, 0 }
   0xd   : > { %p164_p3 = scmp.eq.s32.totalorder %s639_s23, 1  ;;  %p640_p5 = scmp.ge.s32.totalorder %s977_s21, 1 }
   0xe   : > { %p1049_p4 = por %p1335_p1, %p45_p0  ;;  %p171_p7 = scmp.lt.s32.totalorder %s977_s21, 3 }
   0xf   : > { %p1054_p6 = por %p164_p3, %p45_p0  ;;  %s979_s27 = smov [#allocation7]  }
  0x10   : > { %s1344_s24 = scalar_select %p1049_p4, 1, 0 }
  0x11   : > { %s1345_s25 = scalar_select %p1054_p6, 1, 0 }
  0x12   : > { %p1059_p8 = pnand %p640_p5, %p171_p7  ;;  %s183_s28 = sshll.u32 %s979_s27, 4  ;;  %s1063_s28 = int_to_ptr.vmem [resolvable:$true] %s183_s28 }
  0x13   : > { %s980_s30 = smov [#allocation8]   ;;  %s1348_s2 = sld [smem:[#allocation17_spill]] }
  0x14   : > { %p720_p9 = pneg %p1059_p8  ;;  %s196_s6 = sshll.u32 %s980_s30, 4  ;;  %s1074_s6 = int_to_ptr.vmem [resolvable:$true] %s196_s6 }
  0x16   : > { %p1070_p11 = pnand %p720_p9, %p1335_p1 }
  0x18   : > { %p785_p13 = pneg %p1070_p11 }
  0x19   : > { %s783_s9 = scalar_lea.hbm %s1348_s2, 256 }
  0x1a   : > { %p784_p12 = scmp.ne.s32.totalorder %s1348_s2, %s783_s9  ;;  %p790_p5 = scmp.lt.u32.totalorder %s783_s9, %s1348_s2 }
  0x1c   : > { %p786_p0 = pnand %p785_p13, %p784_p12 }
  0x1e   : > { %p787_p3 = pneg %p786_p0 }
  0x20   : > { %p792_p7 = pnand %p790_p5, %p787_p3 }
  0x22   : > { %795 = shalt.err (!%p792_p7)
}
  0x23   : > { %s796_s14 = scalar_lea.vmem %s1063_s28, 256  ;;  %p804_p2 = scmp.lt.s32.totalorder %s1063_s28, %s1063_s28 }
  0x24   : > { %p797_p9 = scmp.ne.s32.totalorder %s1063_s28, %s796_s14  ;;  %p805_p12 = scmp.lt.s32.totalorder %s796_s14, %s796_s14 }
  0x26   : > { %p799_p10 = pnand %p797_p9, %p785_p13  ;;  %p806_p0 = por %p805_p12, %p804_p2 }
  0x28   : > { %p800_p1 = pneg %p799_p10 }
  0x2a   : > { %p807_p6 = pnand %p806_p0, %p800_p1 }
  0x2c   : > { %810 = shalt.err (!%p807_p6)
}
  0x2d   : > { %s1336_s15 = smov 128   ;;  %s1338_s16 = smov 8  }
  0x2e   : > { %723 = dma.hbm_to_vmem [thread:$0]  (!%p1070_p11), %s1348_s2, 256, %s1063_s28, [#allocation6], %s1336_s15, %s1336_s15, %s1338_s16  }
  0x2f   : > { %s811_s7 = scalar_lea.hbm %s1332_s3, 256 }
  0x30   : > { %p812_p1 = scmp.ne.s32.totalorder %s1332_s3, %s811_s7  ;;  %p818_p10 = scmp.lt.u32.totalorder %s811_s7, %s1332_s3 }
  0x32   : > { %p814_p2 = pnand %p812_p1, %p785_p13 }
  0x34   : > { %p815_p6 = pneg %p814_p2 }
  0x36   : > { %p820_p3 = pnand %p818_p10, %p815_p6 }
  0x38   : > { %823 = shalt.err (!%p820_p3)
}
  0x39   : > { %s824_s28 = scalar_lea.vmem %s1074_s6, 256  ;;  %p832_p12 = scmp.lt.s32.totalorder %s1074_s6, %s1074_s6 }
  0x3a   : > { %p825_p5 = scmp.ne.s32.totalorder %s1074_s6, %s824_s28  ;;  %p833_p0 = scmp.lt.s32.totalorder %s824_s28, %s824_s28 }
  0x3c   : > { %p827_p7 = pnand %p825_p5, %p785_p13  ;;  %p834_p1 = por %p833_p0, %p832_p12 }
  0x3e   : > { %p828_p9 = pneg %p827_p7 }
  0x40   : > { %p835_p2 = pnand %p834_p1, %p828_p9 }
  0x42   : > { %838 = shalt.err (!%p835_p2)
}
  0x43   : > { %726 = dma.hbm_to_vmem [thread:$0]  (!%p1070_p11), %s1332_s3, 256, %s1074_s6, [#allocation9], %s1336_s15, %s1336_s15, %s1338_s16  }
  0x44   : > { %s1135_s29 = sadd.s32 1, %s977_s21   ;;  %s32_s14 = sadd.s32 1, %s973_s20 }
  0x45   : > { %s29_s17 = ssub.s32 %s977_s21, %s1135_s29  ;;  %p39_p13 = scmp.ne.s32.totalorder %s973_s20, %s969_s19 }
  0x46   : > { %p30_p6 = scmp.eq.s32.totalorder %s29_s17, 0  ;;  %p40_p10 = scmp.eq.s32.totalorder %s977_s21, 0 }
  0x47   : > { %p1349_p3 = scmp.eq.s32.totalorder %s1040_s22, 1  ;;  %p740_p7 = scmp.lt.s32.totalorder %s977_s21, 2 }
  0x48   : > { %s1151_s27 = scalar_select %p30_p6, %s973_s20, %s32_s14  }
  0x49   : > { %p1145_p5 = por %p1349_p3, %p39_p13  ;;  %p41_p9 = por %p40_p10, %p39_p13 }
  0x4a   : > { %s213_s30 = sand.u32 1, %s973_s20   ;;  %s669_s6 = sshll.u32 %s977_s21, 8 }
  0x4b   : > { %s1350_s23 = scalar_select %p1145_p5, 1, 0 }
  0x4c   : > { %s644_s7 = sshll.u32 %s213_s30, 4  ;;  %s1351_s0 = sld [smem:[#allocation16_spill]] }
  0x4d   : > { %s217_s11 = scalar_lea.vmem [#allocation2], %s644_s7  ;;  %p1162_p11 = pnand %p740_p7, %p41_p9 }
  0x4e   : > { %s224_s28 = sshll.u32 %s217_s11, 4  ;;  %s1169_s17 = scalar_lea.hbm %s1330_s1, %s669_s6  ;;  %s1160_s28 = int_to_ptr.vmem [resolvable:$true] %s224_s28 }
  0x4f   : > { %s238_s8 = scalar_lea.vmem [#allocation5], %s644_s7  ;;  %s1173_s15 = scalar_lea.sflag [#allocation3], %s213_s30 }
  0x50   : > { %s1171_s9 = sshll.u32 %s238_s8, 4  ;;  %p841_p0 = pneg %p1162_p11  ;;  %s1205_s9 = int_to_ptr.vmem [resolvable:$true] %s1171_s9 }
  0x52   : > { %s1158_s10 = scalar_lea.hbm %s1351_s0, %s669_s6  ;;  %s844_s13 = scalar_lea.hbm %s1351_s0, 512 }
  0x53   : > { %s839_s11 = scalar_lea.hbm %s1158_s10, 256  ;;  %p845_p13 = scmp.lt.u32.totalorder %s1158_s10, %s1351_s0 }
  0x54   : > { %p840_p12 = scmp.ne.s32.totalorder %s1158_s10, %s839_s11  ;;  %p846_p6 = scmp.lt.u32.totalorder %s844_s13, %s839_s11 }
  0x55   : > { %p848_p3 = scmp.lt.u32.totalorder %s839_s11, %s1158_s10 }
  0x56   : > { %p842_p1 = pnand %p841_p0, %p840_p12  ;;  %p847_p10 = por %p846_p6, %p845_p13 }
  0x58   : > { %p843_p2 = pneg %p842_p1  ;;  %p849_p7 = por %p848_p3, %p847_p10 }
  0x5a   : > { %p850_p9 = pnand %p849_p7, %p843_p2 }
  0x5c   : > { %853 = shalt.err (!%p850_p9)
}
  0x5d   : > { %s854_s30 = scalar_lea.vmem %s1160_s28, 256  ;;  %s983_s2 = smov [#allocation2]  }
  0x5e   : > { %p855_p12 = scmp.ne.s32.totalorder %s1160_s28, %s854_s30  ;;  %s859_s16 = sshll.u32 %s983_s2, 4  ;;  %s860_s16 = int_to_ptr.vmem [resolvable:$false] %s859_s16 }
  0x5f   : > { %s861_s7 = scalar_lea.vmem %s860_s16, 512  ;;  %p862_p4 = scmp.lt.s32.totalorder %s1160_s28, %s860_s16 }
  0x60   : > { %p857_p1 = pnand %p855_p12, %p841_p0  ;;  %p863_p13 = scmp.lt.s32.totalorder %s861_s7, %s854_s30 }
  0x62   : > { %p858_p5 = pneg %p857_p1  ;;  %p864_p6 = por %p863_p13, %p862_p4 }
  0x64   : > { %p865_p10 = pnand %p864_p6, %p858_p5 }
  0x66   : > { %868 = shalt.err (!%p865_p10)
}
  0x67   : > { %s1353_s8 = smov 8   ;;  %s1354_s11 = smov 128  }
  0x68   : > { %730 = dma.hbm_to_vmem [thread:$0]  (!%p1162_p11), %s1158_s10, 256, %s1160_s28, %s1173_s15, %s1354_s11, %s1354_s11, %s1353_s8  }
  0x69   : > { %s234_s13 = sand.u32 1, %s977_s21   ;;  %s869_s6 = scalar_lea.hbm %s1169_s17, 256 }
  0x6a   : > { %s1208_s14 = scalar_lea.sflag [#allocation6], %s234_s13  ;;  %p870_p4 = scmp.ne.s32.totalorder %s1169_s17, %s869_s6 }
  0x6b   : > { %s874_s16 = scalar_lea.hbm %s1330_s1, 512  ;;  %p875_p3 = scmp.lt.u32.totalorder %s1169_s17, %s1330_s1 }
  0x6c   : > { %p872_p5 = pnand %p870_p4, %p841_p0  ;;  %p876_p7 = scmp.lt.u32.totalorder %s874_s16, %s869_s6 }
  0x6d   : > { %p878_p12 = scmp.lt.u32.totalorder %s869_s6, %s1169_s17 }
  0x6e   : > { %p873_p2 = pneg %p872_p5  ;;  %p877_p9 = por %p876_p7, %p875_p3 }
  0x70   : > { %p879_p1 = por %p878_p12, %p877_p9 }
  0x72   : > { %p880_p13 = pnand %p879_p1, %p873_p2 }
  0x74   : > { %883 = shalt.err (!%p880_p13)
}
  0x75   : > { %s884_s15 = scalar_lea.vmem %s1205_s9, 256  ;;  %s984_s10 = smov [#allocation5]  }
  0x76   : > { %p885_p6 = scmp.ne.s32.totalorder %s1205_s9, %s884_s15  ;;  %s889_s28 = sshll.u32 %s984_s10, 4  ;;  %s890_s28 = int_to_ptr.vmem [resolvable:$false] %s889_s28 }
  0x77   : > { %s891_s0 = scalar_lea.vmem %s890_s28, 512  ;;  %p892_p5 = scmp.lt.s32.totalorder %s1205_s9, %s890_s28 }
  0x78   : > { %p887_p10 = pnand %p885_p6, %p841_p0  ;;  %p893_p3 = scmp.lt.s32.totalorder %s891_s0, %s884_s15 }
  0x7a   : > { %p888_p4 = pneg %p887_p10  ;;  %p894_p7 = por %p893_p3, %p892_p5 }
  0x7c   : > { %p895_p9 = pnand %p894_p7, %p888_p4 }
  0x7e   : > { %898 = shalt.err (!%p895_p9)
}
  0x7f   : > { %733 = dma.hbm_to_vmem [thread:$0]  (!%p1162_p11), %s1169_s17, 256, %s1205_s9, %s1208_s14, %s1354_s11, %s1354_s11, %s1353_s8  }
  0x80   : > { %257 = sbr.rel (%p1059_p8) target bundleno = 604 (0x25c), region = 40  ;;  %s1240_s13 = sand.u32 (!%p1059_p8), 1, %s969_s19  }
  0x81   : > { %s1243_s6 = sshll.u32 (!%p1059_p8), %s1240_s13, 4  ;;  %s260_s12 = scalar_lea.sflag (!%p1059_p8), [#allocation3], %s1240_s13 }
  0x82   : > { %s263_s30 = scalar_lea.vmem (!%p1059_p8), [#allocation2], %s1243_s6  ;;  %p1355_p0 = scmp.ne.s32.totalorder (!%p1059_p8), %s1344_s24, 0 }
  0x87   : > { %944 = dma.done.wait (%p1355_p0), %s260_s12, 256  }
  0x88   : > { %946 = vsyncadd (%p1355_p0), %s260_s12, 4294967040  ;;  %s268_s26 = sand.u32 1, %s1040_s22   ;;  %s272_s9 = scalar_lea.vmem [#allocation5], %s1243_s6 }
  0x89   : > { %s269_s17 = scalar_lea.sflag [#allocation6], %s268_s26 }
  0x8a   : > { %948 = dma.done.wait (%p1355_p0), %s269_s17, 256  }
  0x8b   : > { %950 = vsyncadd (%p1355_p0), %s269_s17, 4294967040  ;;  %p1356_p8 = scmp.eq.s32.totalorder %s1040_s22, 0 }
  0x8d   : > { %952 = dma.done.wait (%p1356_p8), [#allocation6], 256   ;;  %p1357_p11 = pmov %p1356_p8 }
  0x8e   : > { %p1358_p2 = pmov %p1356_p8 }
  0x8f   : > { %954 = vsyncadd (%p1357_p11), [#allocation6], 4294967040 }
  0x90   : > { %956 = dma.done.wait (%p1358_p2), [#allocation9], 256   ;;  %p1359_p12 = pmov %p1358_p2 }
  0x91   : > { %vm321_vm0 = vcmask 261120   ;;  %vm425_vm1 = vcmask 1041408   ;;  %v319_v0 = vld [vmem:[#allocation8] sm:$0xff]  ;;  %v320_v1 = vld [vmem:[#allocation8 + $0x8] sm:$0x3]  ;;  %v409_v4 = vld [vmem:[#allocation7] sm:$0xff] }
  0x92   : > { %958 = vsyncadd (%p1359_p12), [#allocation9], 4294967040  ;;  %v315_v2 = vld [vmem:[%s272_s9] sm:$0xff]  ;;  %v694_v3 = vpack.c.bf16 %v320_v1, %v319_v0  ;;  %v410_v5 = vld [vmem:[#allocation7 + $0x8] sm:$0x3]  ;;  %vm985_vm3 = vmmov 1  }
  0x93   : > { %vm695_vm2 = vmpackc.low %vm321_vm0, %vm321_vm0  ;;  %684 = vmatprep.mubr.msk.f32.mxu0 %vm321_vm0, %v315_v2  ;;  %v700_v6 = vpack.c.bf16 %v410_v5, %v409_v4  ;;  %v316_v7 = vld [vmem:[%s272_s9 + $0x8] sm:$0xff]  ;;  %vm418_vm5 = vcmask 80896   ;;  %v660_v10 = vld [vmem:[%s1333_s4] ss:$0 sm:$0xff]  ;;  %s671_s11 = sshll.u32 %s1040_s22, 8  ;;  %s311_s14 = scalar_lea.vmem [#allocation10], %s1243_s6 }
  0x94   : > { %vm701_vm4 = vmpackc.low %vm425_vm1, %vm985_vm3  ;;  %696 = vmatprep.subr.msk.bf16.mxu0 %vm695_vm2, %v694_v3  ;;  %v318_v11 = vld [vmem:[%s263_s30 + $0x8] sm:$0xff]  ;;  %v317_v14 = vld [vmem:[%s263_s30] sm:$0xff]  ;;  %s524_s2 = sshll.u32 %s311_s14, 4  ;;  %s1281_s15 = scalar_lea.hbm %s1334_s5, %s671_s11  ;;  %s1283_s2 = int_to_ptr.vmem [resolvable:$true] %s524_s2 }
  0x95   : > { %699 = vmatpush3.bf16.xpose.msk.msra.mxu0 %vm695_vm2, %v694_v3  ;;  %702 = vmatprep.subr.msk.bf16.mxu1 %vm701_vm4, %v700_v6  ;;  %s511_s22 = scalar_lea.sflag [#allocation4], %s1240_s13  ;;  %s899_s10 = scalar_lea.vmem %s1283_s2, 256 }
  0x96   : > { %705 = vmatpush3.bf16.msk.msra.mxu1 %vm701_vm4, %v700_v6  ;;  %p900_p1 = scmp.ne.s32.totalorder %s1283_s2, %s899_s10  ;;  %p1360_p13 = scmp.ne.s32.totalorder %s1350_s23, 0 }
  0x97   : > { %s986_s28 = smov [#allocation10]  }
  0x98   : > { %p901_p6 = pnand %p900_p1, %p1360_p13  ;;  %s903_s0 = sshll.u32 %s986_s28, 4  ;;  %s904_s0 = int_to_ptr.vmem [resolvable:$false] %s903_s0 }
  0x99   : > { %s905_s6 = scalar_lea.vmem %s904_s0, 512  ;;  %p906_p4 = scmp.lt.s32.totalorder %s1283_s2, %s904_s0 }
  0x9a   : > { %p902_p10 = pneg %p901_p6  ;;  %p907_p5 = scmp.lt.s32.totalorder %s905_s6, %s899_s10 }
  0x9c   : > { %685 = vmatmul.mubr.msk.f32.vlgmr.msra.gmra.mrb[0].mxu0 %vm321_vm0, %v316_v7  ;;  %p908_p3 = por %p907_p5, %p906_p4 }
  0x9e   : > { %p909_p7 = pnand %p908_p3, %p902_p10 }
 0x16f   : > { %v686_v8 = vpop.f32.mrb[0].mxu0 }
 0x170   : > { %v400_v9 = vpop.f32.mrb[1].mxu0 }
 0x171   : > { %691 = vmatprep.mubr.msk.f32.mxu1 %vm418_vm5, %v400_v9 }
 0x172   : > { %692 = vmatmul.mubr.msk.f32.vlgmr.msra.gmra.mrb[0].mxu1 %vm418_vm5, %v686_v8 }
 0x245   : > { %v693_v12 = vpop.f32.mrb[0].mxu1 }
 0x246   : > { %v501_v13 = vadd.f32 %v693_v12, %v660_v10  ;;  %v495_v15 = vpop.f32.mrb[1].mxu1 }
 0x247   : > { %v496_v16 = vadd.f32 %v660_v10, %v495_v15 }
 0x248   : > { %v505_v17 = vmul.f32 %v501_v13, %v318_v11 }
 0x249   : > { %v504_v18 = vmul.f32 %v496_v16, %v317_v14 }
 0x24a   : > { %v507_v19 = vadd.f32 %v505_v17, %v316_v7 }
 0x24b   : > { %v506_v20 = vadd.f32 %v504_v18, %v315_v2 }
 0x24c   : > { %509 = vst.msk [vmem:[%s311_s14 + $0x8] sm:$0xff] %vm321_vm0, %v507_v19 }
 0x24d   : > { %508 = vst.msk [vmem:[%s311_s14] sm:$0xff] %vm321_vm0, %v506_v20 }
 0x24e   : > { %912 = shalt.err (!%p909_p7)
}
 0x24f   : > { %s913_s12 = scalar_lea.hbm %s1281_s15, 256  ;;  %s917_s17 = scalar_lea.hbm %s1334_s5, 512 }
 0x250   : > { %p914_p9 = scmp.ne.s32.totalorder %s1281_s15, %s913_s12  ;;  %p918_p11 = scmp.lt.u32.totalorder %s1281_s15, %s1334_s5 }
 0x251   : > { %p919_p2 = scmp.lt.u32.totalorder %s917_s17, %s913_s12  ;;  %p921_p1 = scmp.lt.u32.totalorder %s913_s12, %s1281_s15 }
 0x252   : > { %p915_p0 = pnand %p914_p9, %p1360_p13 }
 0x253   : > { %p920_p12 = por %p919_p2, %p918_p11 }
 0x254   : > { %p916_p8 = pneg %p915_p0 }
 0x255   : > { %p922_p6 = por %p921_p1, %p920_p12 }
 0x257   : > { %p923_p10 = pnand %p922_p6, %p916_p8 }
 0x259   : > { %926 = shalt.err (!%p923_p10)
}
 0x25a   : > { %s987_s8 = smov 128   ;;  %s988_s11 = smov 8  }
 0x25b   : > { %718 = dma.vmem_to_hbm [thread:$0]  (%p1360_p13), %s1283_s2, 256, %s1281_s15, %s511_s22, %s987_s8, %s987_s8, %s988_s11  }
 0x25c PF: > { %s539_s14 = sand.u32 1, %s965_s18   ;;  %p1361_p4 = scmp.ne.s32.totalorder %s1345_s25, 0 }
 0x25d   : > { %p1362_p5 = scmp.ge.s32.totalorder %s977_s21, 2  ;;  %s540_s16 = scalar_lea.sflag [#allocation4], %s539_s14 }
 0x25f   : > { %p735_p3 = pnand %p1362_p5, %p1361_p4 }
 0x261   : > { %960 = dma.done.wait (!%p735_p3), %s540_s16, 256  }
 0x262   : > { %962 = vsyncadd (!%p735_p3), %s540_s16, 4294967040  ;;  %p22_p7 = scmp.ge.s32.totalorder %s1135_s29, 4   ;;  %s1363_s18 = smov %s969_s19 }
 0x263   : > { %s1364_s19 = smov %s973_s20  ;;  %s1365_s20 = smov %s1151_s27 }
 0x264   : > { %s1366_s21 = smov %s1135_s29  ;;  %24 = sbr.rel (!%p22_p7) target bundleno = 11 (0xb), region = 106 }
 0x26b   :  { %545 = vsyncpa [#allocation3], 1 }
 0x26c   :  { %547 = vsyncpa [#allocation3 + $0x1], 1 }
 0x26d   :  { %548 = vsyncpa [#allocation6], 1 }
 0x26e   :  { %550 = vsyncpa [#allocation6 + $0x1], 1 }
 0x26f   :  { %551 = vsyncpa [#allocation9], 1 }
 0x270   :  { %552 = vsyncpa [#allocation4], 1 }
 0x271   :  { %554 = vsyncpa [#allocation4 + $0x1], 1 }

</bundles_post_ra>
